<compile_context>
chip_gen: v5e
topology: v5e:2x2
jax: 0.10.0
libtpu: 0.0.40
codegen_flags: <defaults>
</compile_context>

<pallas_src>
import functools

import jax
import jax.numpy as jnp
from jax import lax
from jax.experimental import pallas as pl
from jax.experimental.pallas import tpu as pltpu

LEAKY_SLOPE = 0.2
BN_EPS = 1e-5          # PyTorch BatchNorm2d default eps
KH = KW = 4


def _round_up(a, b):
    return (a + b - 1) // b * b


def _vmem_limit_bytes():
    """Generation-aware scoped-VMEM limit: ~75% of physical, capped at 100 MiB.

    v5e/v6e (128 MiB physical) -> 96 MiB; v7x (64 MiB physical) -> 48 MiB.
    """
    try:
        cap = int(pltpu.get_tpu_info().vmem_capacity_bytes)
    except Exception:
        cap = 64 * 1024 * 1024
    return int(min(cap * 3 // 4, 100 * 1024 * 1024))


def _choose_tm(m, kf_pad, cout_pad, vmem_limit, max_tm):
    """Largest M tile s.t. double-buffered bf16 patches + (double-buffered) resident
    weights + double-buffered f32 conv/output tiles fit in ~70% of the VMEM limit."""
    weights_bytes = 2 * kf_pad * cout_pad * 2           # x2: default double-buffering
    budget = int(vmem_limit * 0.70) - weights_bytes
    per_row = 2 * (kf_pad * 2) + 2 * (cout_pad * 4)     # patches (bf16) + conv (f32)
    tm = budget // per_row if budget > 0 else 128
    tm = max(128, min(1024, tm))
    tm = (tm // 128) * 128
    if m <= tm:
        tm = _round_up(max(m, 8), 16)                   # single tile covers everything
    if max_tm is not None:
        tm = max(16, min(tm, (max_tm // 16) * 16))
    return tm


# --------------------------------------------------------------------------------
# Split path, call 1: conv tile on the MXU, store un-normalized conv, accumulate
# per-channel sublane-partial batch statistics.
# --------------------------------------------------------------------------------
def _conv_stats_kernel(p_ref, w_ref, conv_ref, sum_ref, sumsq_ref):
    i = pl.program_id(1)                                 # M-tile index inside this split
    conv = jnp.dot(p_ref[...], w_ref[...], preferred_element_type=jnp.float32)
    conv_ref[...] = conv                                  # keep the raw conv for pass 2

    # Sublane-partial accumulation: fold rows into an [8, Cout] partial with pure
    # vreg-to-vreg adds; the cross-sublane 8->1 collapse happens once, outside.
    part = conv.reshape(-1, 8, conv.shape[-1])
    psum = jnp.sum(part, axis=0)
    psq = jnp.sum(part * part, axis=0)

    @pl.when(i == 0)
    def _init():
        sum_ref[...] = jnp.zeros_like(sum_ref)
        sumsq_ref[...] = jnp.zeros_like(sumsq_ref)

    sum_ref[...] += psum
    sumsq_ref[...] += psq


# --------------------------------------------------------------------------------
# Split path, call 2: in-place (aliased) BN scale/shift + LeakyReLU on the stored conv.
# --------------------------------------------------------------------------------
def _bn_lrelu_kernel(scale_ref, shift_ref, conv_ref, o_ref):
    y = conv_ref[...] * scale_ref[...] + shift_ref[...]
    o_ref[...] = jnp.where(y >= 0.0, y, LEAKY_SLOPE * y)


# --------------------------------------------------------------------------------
# Fused recompute path (shallow layers only): phase 0 streams all M tiles for stats,
# phase 1 recomputes the cheap conv tile and normalizes + stores.
# --------------------------------------------------------------------------------
def _fused_recompute_kernel(p_ref, w_ref, g_ref, b_ref, o_ref,
                            sum_sc, sumsq_sc, scale_sc, shift_sc, *, inv_m):
    ph = pl.program_id(0)                                # 0 = stats, 1 = normalize
    i = pl.program_id(1)                                 # M-tile index
    conv = jnp.dot(p_ref[...], w_ref[...], preferred_element_type=jnp.float32)

    @pl.when((ph == 0) & (i == 0))
    def _init():
        sum_sc[...] = jnp.zeros_like(sum_sc)
        sumsq_sc[...] = jnp.zeros_like(sumsq_sc)

    @pl.when(ph == 0)
    def _stats():
        part = conv.reshape(-1, 8, conv.shape[-1])
        sum_sc[...] += jnp.sum(part, axis=0)
        sumsq_sc[...] += jnp.sum(part * part, axis=0)

    @pl.when((ph == 1) & (i == 0))
    def _finalize():
        mean = jnp.sum(sum_sc[...], axis=0, keepdims=True) * inv_m
        ex2 = jnp.sum(sumsq_sc[...], axis=0, keepdims=True) * inv_m
        # var = E[x^2] - mean^2 in f32: safe while |mean| << std (true for conv outputs
        # of near-zero-mean weights); padded rows/channels contribute exact zeros.
        var = jnp.maximum(ex2 - mean * mean, 0.0)
        scale = g_ref[...] * lax.rsqrt(var + BN_EPS)
        scale_sc[...] = scale
        shift_sc[...] = b_ref[...] - mean * scale

    @pl.when(ph == 1)
    def _store():
        y = conv * scale_sc[...] + shift_sc[...]
        o_ref[...] = jnp.where(y >= 0.0, y, LEAKY_SLOPE * y).astype(o_ref.dtype)


def unet_down_forward(x_nchw, w_oihw, gamma, beta, *, max_tm=None):
    """x_nchw: [N, Cin, H, W]; w_oihw: [Cout, Cin, 4, 4] (PyTorch layouts). f32 out."""
    N, Cin, H, W = x_nchw.shape
    Cout = w_oihw.shape[0]
    Ho, Wo = H // 2, W // 2
    M = N * Ho * Wo
    Kf = Cin * KH * KW

    kf_pad = _round_up(Kf, 128)
    cout_pad = _round_up(Cout, 128)
    vmem_limit = _vmem_limit_bytes()
    tm = _choose_tm(M, kf_pad, cout_pad, vmem_limit, max_tm)

    # Shallow layers: re-reading the thin bf16 patches tile + one extra matmul is
    # cheaper than the f32 conv HBM round trip of the split path.
    use_fused = (kf_pad * 2) < (8 * cout_pad)

    n_i = pl.cdiv(M, tm)
    if use_fused:
        n_split, n_i_inner = 1, n_i
    else:
        n_split = 2 if n_i >= 2 else 1                   # feed both v7x TensorCores
        n_i_inner = pl.cdiv(n_i, n_split)
        n_i = n_split * n_i_inner
    m_pad = tm * n_i

    # ---- glue: NCHW -> NHWC bf16, pad by 1, im2col (pure data movement) ----
    x = jnp.transpose(x_nchw, (0, 2, 3, 1)).astype(jnp.bfloat16)         # [N,H,W,Cin]
    x_pad = jnp.pad(x, ((0, 0), (1, 1), (1, 1), (0, 0)))
    taps = [x_pad[:, kh:kh + 2 * Ho:2, kw:kw + 2 * Wo:2, :]
            for kh in range(KH) for kw in range(KW)]                     # [N,Ho,Wo,Cin]
    pat = jnp.stack(taps, axis=-1)                                       # [N,Ho,Wo,Cin,16]
    patches = pat.reshape(M, Kf)                                         # ci*16 + kh*4 + kw
    patches = jnp.pad(patches, ((0, m_pad - M), (0, kf_pad - Kf)))       # exact zero pad

    w2 = jnp.transpose(w_oihw.astype(jnp.bfloat16), (1, 2, 3, 0)).reshape(Kf, Cout)
    w2 = jnp.pad(w2, ((0, kf_pad - Kf), (0, cout_pad - Cout)))
    g2 = jnp.pad(gamma.astype(jnp.float32), (0, cout_pad - Cout)).reshape(1, cout_pad)
    b2 = jnp.pad(beta.astype(jnp.float32), (0, cout_pad - Cout)).reshape(1, cout_pad)

    if use_fused:
        kernel = functools.partial(_fused_recompute_kernel, inv_m=1.0 / M)
        out_padded = pl.pallas_call(
            kernel,
            out_shape=jax.ShapeDtypeStruct((m_pad, cout_pad), jnp.float32),
            grid_spec=pltpu.PrefetchScalarGridSpec(
                num_scalar_prefetch=0,
                grid=(2, n_i),                           # (phase, M tiles)
                in_specs=[
                    # patches: streamed along M (re-streamed in phase 1 by design).
                    pl.BlockSpec((tm, kf_pad), lambda ph, i: (i, 0)),
                    # weights / gamma / beta: constant block index -> resident in VMEM.
                    pl.BlockSpec((kf_pad, cout_pad), lambda ph, i: (0, 0)),
                    pl.BlockSpec((1, cout_pad), lambda ph, i: (0, 0)),
                    pl.BlockSpec((1, cout_pad), lambda ph, i: (0, 0)),
                ],
                # Output block index is pinned to (0, 0) for the whole stats phase, so
                # Pallas never writes back the (still untouched) output buffer before
                # phase 1 fills it; each block is flushed to HBM exactly once, with
                # normalized data.  This relies on Pallas only writing back output
                # blocks when the block index changes (documented + tested below).
                out_specs=pl.BlockSpec((tm, cout_pad), lambda ph, i: (ph * i, 0)),
                scratch_shapes=[
                    pltpu.VMEM((8, cout_pad), jnp.float32),   # sublane-partial sum
                    pltpu.VMEM((8, cout_pad), jnp.float32),   # sublane-partial sum sq
                    pltpu.VMEM((1, cout_pad), jnp.float32),   # folded BN scale
                    pltpu.VMEM((1, cout_pad), jnp.float32),   # folded BN shift
                ],
            ),
            compiler_params=pltpu.CompilerParams(
                dimension_semantics=("arbitrary", "arbitrary"),
                vmem_limit_bytes=vmem_limit),
        )(patches, w2, g2, b2)
    else:
        # ---- call 1: conv + per-core partial stats ----
        conv_buf, sum_part, sq_part = pl.pallas_call(
            _conv_stats_kernel,
            out_shape=(
                jax.ShapeDtypeStruct((m_pad, cout_pad), jnp.float32),
                jax.ShapeDtypeStruct((8 * n_split, cout_pad), jnp.float32),
                jax.ShapeDtypeStruct((8 * n_split, cout_pad), jnp.float32),
            ),
            grid_spec=pltpu.PrefetchScalarGridSpec(
                num_scalar_prefetch=0,
                grid=(n_split, n_i_inner),               # (core split of M, M tiles)
                in_specs=[
                    # patches: streamed, read exactly once.
                    pl.BlockSpec((tm, kf_pad),
                                 lambda c, i: (c * n_i_inner + i, 0)),
                    # weights: constant block index -> fetched once, resident.
                    # TODO(synk): pipeline_mode=pl.Buffered(1) would drop the dead
                    # second weight buffer (helps v7x's 64 MiB VMEM for deep layers).
                    pl.BlockSpec((kf_pad, cout_pad), lambda c, i: (0, 0)),
                ],
                out_specs=[
                    pl.BlockSpec((tm, cout_pad),
                                 lambda c, i: (c * n_i_inner + i, 0)),
                    pl.BlockSpec((8, cout_pad), lambda c, i: (c, 0)),
                    pl.BlockSpec((8, cout_pad), lambda c, i: (c, 0)),
                ],
            ),
            compiler_params=pltpu.CompilerParams(
                # Leading axis splits M across TensorCores (v7x megacore); stats are
                # per-core partials combined in the tiny fold below.
                dimension_semantics=("parallel", "arbitrary"),
                vmem_limit_bytes=vmem_limit),
        )(patches, w2)

        # ---- tiny fold: batch stats + affine params -> per-channel scale/shift ----
        total = jnp.sum(sum_part, axis=0, keepdims=True)           # [1, cout_pad]
        total_sq = jnp.sum(sq_part, axis=0, keepdims=True)
        mean = total / M                                            # true M divisor
        var = jnp.maximum(total_sq / M - mean * mean, 0.0)          # biased batch var
        scale = g2 * lax.rsqrt(var + BN_EPS)
        shift = b2 - mean * scale

        # ---- call 2: in-place normalize + LeakyReLU (conv buffer aliased to out) ----
        out_padded = pl.pallas_call(
            _bn_lrelu_kernel,
            out_shape=jax.ShapeDtypeStruct((m_pad, cout_pad), jnp.float32),
            grid_spec=pltpu.PrefetchScalarGridSpec(
                num_scalar_prefetch=0,
                grid=(n_i,),
                in_specs=[
                    pl.BlockSpec((1, cout_pad), lambda i: (0, 0)),   # scale (resident)
                    pl.BlockSpec((1, cout_pad), lambda i: (0, 0)),   # shift (resident)
                    pl.BlockSpec((tm, cout_pad), lambda i: (i, 0)),  # stored conv
                ],
                out_specs=pl.BlockSpec((tm, cout_pad), lambda i: (i, 0)),
            ),
            input_output_aliases={2: 0},                 # read + overwrite same buffer
            compiler_params=pltpu.CompilerParams(
                dimension_semantics=("parallel",),
                vmem_limit_bytes=vmem_limit),
        )(scale, shift, conv_buf)

    # ---- glue: [m_pad, cout_pad] -> [N, Cout, Ho, Wo] ----
    # TODO(synk): emit bf16 / NHWC directly if the consumer accepts it (halves the
    # writeback and removes this transpose pass); kept f32 NCHW to match the module.
    y = out_padded[:M, :Cout].reshape(N, Ho, Wo, Cout)
    return jnp.transpose(y, (0, 3, 1, 2))


def unet_down_reference(x_nchw, w_oihw, gamma, beta):
    """Reference with the same numerics as the kernel's MXU path (bf16 operands,
    f32 accumulation, f32 train-mode batch statistics)."""
    conv = lax.conv_general_dilated(
        x_nchw.astype(jnp.bfloat16), w_oihw.astype(jnp.bfloat16),
        window_strides=(2, 2), padding=((1, 1), (1, 1)),
        dimension_numbers=("NCHW", "OIHW", "NCHW"),
        preferred_element_type=jnp.float32)
    mean = jnp.mean(conv, axis=(0, 2, 3), keepdims=True)
    var = jnp.mean(jnp.square(conv - mean), axis=(0, 2, 3), keepdims=True)
    xhat = (conv - mean) * lax.rsqrt(var + BN_EPS)
    y = xhat * gamma.reshape(1, -1, 1, 1) + beta.reshape(1, -1, 1, 1)
    return jnp.where(y >= 0, y, LEAKY_SLOPE * y)


if __name__ == "__main__":
    fwd = jax.jit(unet_down_forward, static_argnames=("max_tm",))

    def run_case(name, N, Cin, H, W, Cout, key, max_tm=None):
        kx, kw = jax.random.split(key)
        x = jax.random.normal(kx, (N, Cin, H, W), dtype=jnp.float32)
        # Conv2d has bias=False in the module; BN affine params are synthetic.
        w = jax.random.normal(kw, (Cout, Cin, KH, KW), dtype=jnp.float32) * 0.05
        gamma = 1.0 + 0.01 * jnp.arange(Cout, dtype=jnp.float32)
        beta = 0.01 * jnp.arange(Cout, dtype=jnp.float32)

        out = jax.block_until_ready(fwd(x, w, gamma, beta, max_tm=max_tm))
        ref = jax.block_until_ready(unet_down_reference(x, w, gamma, beta))
        assert out.shape == (N, Cout, H // 2, W // 2), (name, out.shape)
        max_err = float(jnp.max(jnp.abs(out - ref)))
        assert jnp.allclose(out, ref, atol=2e-3, rtol=2e-3), (name, max_err)

    root = jax.random.PRNGKey(0)
    k1, k2, k3 = jax.random.split(root, 3)
    # 1) Shallow layer -> fused recompute path, single M tile (module-sized example).
    run_case("fused_single_tile", 2, 4, 16, 16, 32, k1)
    # 2) Deeper layer -> split path (conv+stats, then in-place normalize) with
    #    multiple M tiles and a 2-way core split of the partial stats.
    run_case("split_multi_tile", 2, 32, 32, 32, 64, k2, max_tm=128)
    # 3) Shallow layer with several M tiles -> exercises the phase-0 output pin and
    #    multi-tile stats accumulation of the fused path.
    run_case("fused_multi_tile", 2, 4, 32, 32, 32, k3, max_tm=128)

    print("KERNEL_OK")
</pallas_src>

<mosaic_0001>
module attributes {stable_mosaic.version = 11 : i64} {
  func.func @_fused_recompute_kernel(%arg0: i32, %arg1: i32, %arg2: memref<128x128xbf16, #tpu.memory_space<vmem>>, %arg3: memref<128x128xbf16, #tpu.memory_space<vmem>>, %arg4: memref<1x128xf32, #tpu.memory_space<vmem>>, %arg5: memref<1x128xf32, #tpu.memory_space<vmem>>, %arg6: memref<128x128xf32, #tpu.memory_space<vmem>>, %arg7: memref<8x128xf32, #tpu.memory_space<vmem>>, %arg8: memref<8x128xf32, #tpu.memory_space<vmem>>, %arg9: memref<1x128xf32, #tpu.memory_space<vmem>>, %arg10: memref<1x128xf32, #tpu.memory_space<vmem>>) attributes {dimension_semantics = [#tpu.dimension_semantics<arbitrary>, #tpu.dimension_semantics<arbitrary>], iteration_bounds = array<i64: 2, 1>, scalar_prefetch = 0 : i64, scratch_operands = 4 : i64, tpu.core_type = #tpu.core_type<tc>, window_params = [{transform_indices = @transform_0, window_bounds = array<i64: 128, 128>}, {pipeline_mode = #tpu.pipeline_mode<synchronous>, transform_indices = @transform_1, window_bounds = array<i64: 128, 128>}, {pipeline_mode = #tpu.pipeline_mode<synchronous>, transform_indices = @transform_2, window_bounds = array<i64: 1, 128>}, {pipeline_mode = #tpu.pipeline_mode<synchronous>, transform_indices = @transform_3, window_bounds = array<i64: 1, 128>}, {transform_indices = @transform_4, window_bounds = array<i64: 128, 128>}]} {
    %c0 = arith.constant 0 : index
    %c0_0 = arith.constant 0 : index
    %0 = vector.load %arg2[%c0, %c0_0] : memref<128x128xbf16, #tpu.memory_space<vmem>>, vector<128x128xbf16>
    %c0_1 = arith.constant 0 : index
    %c0_2 = arith.constant 0 : index
    %1 = vector.load %arg3[%c0_1, %c0_2] : memref<128x128xbf16, #tpu.memory_space<vmem>>, vector<128x128xbf16>
    %cst = arith.constant dense<0.000000e+00> : vector<128x128xf32>
    %2 = tpu.matmul %0, %1, %cst {dimension_numbers = #tpu.dot_dimension_numbers<[1], [0], [0], [1], [0, 0, 1, 1], [], []>} : vector<128x128xbf16>, vector<128x128xbf16>, vector<128x128xf32> -> vector<128x128xf32>
    %c0_i32 = arith.constant 0 : i32
    %3 = arith.cmpi eq, %arg0, %c0_i32 : i32
    %c0_i32_3 = arith.constant 0 : i32
    %4 = arith.cmpi eq, %arg1, %c0_i32_3 : i32
    %5 = arith.andi %3, %4 : i1
    %6 = arith.extui %5 : i1 to i32
    %c0_i32_4 = arith.constant 0 : i32
    %7 = arith.cmpi ne, %6, %c0_i32_4 : i32
    scf.if %7 {
      %cst_11 = arith.constant 0.000000e+00 : f32
      %19 = vector.broadcast %cst_11 : f32 to vector<8x128xf32>
      %c0_12 = arith.constant 0 : index
      %c0_13 = arith.constant 0 : index
      %20 = vector.load %arg7[%c0_12, %c0_13] : memref<8x128xf32, #tpu.memory_space<vmem>>, vector<8x128xf32>
      tpu.vector_store %arg7[%c0_12, %c0_13], %19 {strides = array<i32>} : memref<8x128xf32, #tpu.memory_space<vmem>>, vector<8x128xf32>,
      %cst_14 = arith.constant 0.000000e+00 : f32
      %21 = vector.broadcast %cst_14 : f32 to vector<8x128xf32>
      %c0_15 = arith.constant 0 : index
      %c0_16 = arith.constant 0 : index
      %22 = vector.load %arg8[%c0_15, %c0_16] : memref<8x128xf32, #tpu.memory_space<vmem>>, vector<8x128xf32>
      tpu.vector_store %arg8[%c0_15, %c0_16], %21 {strides = array<i32>} : memref<8x128xf32, #tpu.memory_space<vmem>>, vector<8x128xf32>,
    } else {
    }
    %c0_i32_5 = arith.constant 0 : i32
    %8 = arith.cmpi eq, %arg0, %c0_i32_5 : i32
    %9 = arith.extui %8 : i1 to i32
    %c0_i32_6 = arith.constant 0 : i32
    %10 = arith.cmpi ne, %9, %c0_i32_6 : i32
    scf.if %10 {
      %19 = vector.shape_cast %2 : vector<128x128xf32> to vector<16x8x128xf32>
      %c0_11 = arith.constant 0 : index
      %c0_12 = arith.constant 0 : index
      %20 = vector.load %arg7[%c0_11, %c0_12] : memref<8x128xf32, #tpu.memory_space<vmem>>, vector<8x128xf32>
      %cst_13 = arith.constant dense<0.000000e+00> : vector<8x128xf32>
      %21 = vector.multi_reduction <add>, %19, %cst_13 [0] : vector<16x8x128xf32> to vector<8x128xf32>
      %22 = arith.addf %20, %21 : vector<8x128xf32>
      %c0_14 = arith.constant 0 : index
      %c0_15 = arith.constant 0 : index
      %23 = vector.load %arg7[%c0_14, %c0_15] : memref<8x128xf32, #tpu.memory_space<vmem>>, vector<8x128xf32>
      tpu.vector_store %arg7[%c0_14, %c0_15], %22 {strides = array<i32>} : memref<8x128xf32, #tpu.memory_space<vmem>>, vector<8x128xf32>,
      %c0_16 = arith.constant 0 : index
      %c0_17 = arith.constant 0 : index
      %24 = vector.load %arg8[%c0_16, %c0_17] : memref<8x128xf32, #tpu.memory_space<vmem>>, vector<8x128xf32>
      %25 = arith.mulf %19, %19 : vector<16x8x128xf32>
      %cst_18 = arith.constant dense<0.000000e+00> : vector<8x128xf32>
      %26 = vector.multi_reduction <add>, %25, %cst_18 [0] : vector<16x8x128xf32> to vector<8x128xf32>
      %27 = arith.addf %24, %26 : vector<8x128xf32>
      %c0_19 = arith.constant 0 : index
      %c0_20 = arith.constant 0 : index
      %28 = vector.load %arg8[%c0_19, %c0_20] : memref<8x128xf32, #tpu.memory_space<vmem>>, vector<8x128xf32>
      tpu.vector_store %arg8[%c0_19, %c0_20], %27 {strides = array<i32>} : memref<8x128xf32, #tpu.memory_space<vmem>>, vector<8x128xf32>,
    } else {
    }
    %c1_i32 = arith.constant 1 : i32
    %11 = arith.cmpi eq, %arg0, %c1_i32 : i32
    %c0_i32_7 = arith.constant 0 : i32
    %12 = arith.cmpi eq, %arg1, %c0_i32_7 : i32
    %13 = arith.andi %11, %12 : i1
    %14 = arith.extui %13 : i1 to i32
    %c0_i32_8 = arith.constant 0 : i32
    %15 = arith.cmpi ne, %14, %c0_i32_8 : i32
    scf.if %15 {
      %c0_11 = arith.constant 0 : index
      %c0_12 = arith.constant 0 : index
      %19 = vector.load %arg7[%c0_11, %c0_12] : memref<8x128xf32, #tpu.memory_space<vmem>>, vector<8x128xf32>
      %cst_13 = arith.constant dense<0.000000e+00> : vector<128xf32>
      %20 = vector.multi_reduction <add>, %19, %cst_13 [0] : vector<8x128xf32> to vector<128xf32>
      %21 = vector.shape_cast %20 : vector<128xf32> to vector<1x128xf32>
      %cst_14 = arith.constant 7.812500e-03 : f32
      %22 = vector.broadcast %cst_14 : f32 to vector<1x128xf32>
      %23 = arith.mulf %21, %22 : vector<1x128xf32>
      %c0_15 = arith.constant 0 : index
      %c0_16 = arith.constant 0 : index
      %24 = vector.load %arg8[%c0_15, %c0_16] : memref<8x128xf32, #tpu.memory_space<vmem>>, vector<8x128xf32>
      %cst_17 = arith.constant dense<0.000000e+00> : vector<128xf32>
      %25 = vector.multi_reduction <add>, %24, %cst_17 [0] : vector<8x128xf32> to vector<128xf32>
      %26 = vector.shape_cast %25 : vector<128xf32> to vector<1x128xf32>
      %cst_18 = arith.constant 7.812500e-03 : f32
      %27 = vector.broadcast %cst_18 : f32 to vector<1x128xf32>
      %28 = arith.mulf %26, %27 : vector<1x128xf32>
      %29 = arith.mulf %23, %23 : vector<1x128xf32>
      %30 = arith.subf %28, %29 : vector<1x128xf32>
      %cst_19 = arith.constant 0.000000e+00 : f32
      %31 = vector.broadcast %cst_19 : f32 to vector<1x128xf32>
      %32 = arith.maximumf %30, %31 : vector<1x128xf32>
      %c0_20 = arith.constant 0 : index
      %c0_21 = arith.constant 0 : index
      %33 = vector.load %arg4[%c0_20, %c0_21] : memref<1x128xf32, #tpu.memory_space<vmem>>, vector<1x128xf32>
      %cst_22 = arith.constant 9.99999974E-6 : f32
      %34 = vector.broadcast %cst_22 : f32 to vector<1x128xf32>
      %35 = arith.addf %32, %34 : vector<1x128xf32>
      %36 = math.rsqrt %35 : vector<1x128xf32>
      %37 = arith.mulf %33, %36 : vector<1x128xf32>
      %c0_23 = arith.constant 0 : index
      %c0_24 = arith.constant 0 : index
      %38 = vector.load %arg9[%c0_23, %c0_24] : memref<1x128xf32, #tpu.memory_space<vmem>>, vector<1x128xf32>
      tpu.vector_store %arg9[%c0_23, %c0_24], %37 {strides = array<i32>} : memref<1x128xf32, #tpu.memory_space<vmem>>, vector<1x128xf32>,
      %c0_25 = arith.constant 0 : index
      %c0_26 = arith.constant 0 : index
      %39 = vector.load %arg5[%c0_25, %c0_26] : memref<1x128xf32, #tpu.memory_space<vmem>>, vector<1x128xf32>
      %40 = arith.mulf %23, %37 : vector<1x128xf32>
      %41 = arith.subf %39, %40 : vector<1x128xf32>
      %c0_27 = arith.constant 0 : index
      %c0_28 = arith.constant 0 : index
      %42 = vector.load %arg10[%c0_27, %c0_28] : memref<1x128xf32, #tpu.memory_space<vmem>>, vector<1x128xf32>
      tpu.vector_store %arg10[%c0_27, %c0_28], %41 {strides = array<i32>} : memref<1x128xf32, #tpu.memory_space<vmem>>, vector<1x128xf32>,
    } else {
    }
    %c1_i32_9 = arith.constant 1 : i32
    %16 = arith.cmpi eq, %arg0, %c1_i32_9 : i32
    %17 = arith.extui %16 : i1 to i32
    %c0_i32_10 = arith.constant 0 : i32
    %18 = arith.cmpi ne, %17, %c0_i32_10 : i32
    scf.if %18 {
      %c0_11 = arith.constant 0 : index
      %c0_12 = arith.constant 0 : index
      %19 = vector.load %arg9[%c0_11, %c0_12] : memref<1x128xf32, #tpu.memory_space<vmem>>, vector<1x128xf32>
      %20 = vector.broadcast %19 : vector<1x128xf32> to vector<128x128xf32>
      %21 = arith.mulf %2, %20 : vector<128x128xf32>
      %c0_13 = arith.constant 0 : index
      %c0_14 = arith.constant 0 : index
      %22 = vector.load %arg10[%c0_13, %c0_14] : memref<1x128xf32, #tpu.memory_space<vmem>>, vector<1x128xf32>
      %23 = vector.broadcast %22 : vector<1x128xf32> to vector<128x128xf32>
      %24 = arith.addf %21, %23 : vector<128x128xf32>
      %cst_15 = arith.constant 0.000000e+00 : f32
      %25 = vector.broadcast %cst_15 : f32 to vector<128x128xf32>
      %26 = arith.cmpf oge, %24, %25 : vector<128x128xf32>
      %cst_16 = arith.constant 2.000000e-01 : f32
      %27 = vector.broadcast %cst_16 : f32 to vector<128x128xf32>
      %28 = arith.mulf %27, %24 : vector<128x128xf32>
      %29 = arith.select %26, %24, %28 : vector<128x128xi1>, vector<128x128xf32>
      %c0_17 = arith.constant 0 : index
      %c0_18 = arith.constant 0 : index
      %30 = vector.load %arg6[%c0_17, %c0_18] : memref<128x128xf32, #tpu.memory_space<vmem>>, vector<128x128xf32>
      tpu.vector_store %arg6[%c0_17, %c0_18], %29 {strides = array<i32>} : memref<128x128xf32, #tpu.memory_space<vmem>>, vector<128x128xf32>,
    } else {
    }
    return
  }
  func.func @transform_0(%arg0: i32, %arg1: i32) -> (i32, i32) {
    %c0_i32 = arith.constant 0 : i32
    %c0_i32_0 = arith.constant 0 : i32
    return %arg1, %c0_i32 : i32, i32
  }
  func.func @transform_1(%arg0: i32, %arg1: i32) -> (i32, i32) {
    %c0_i32 = arith.constant 0 : i32
    %c0_i32_0 = arith.constant 0 : i32
    %c0_i32_1 = arith.constant 0 : i32
    return %c0_i32, %c0_i32_0 : i32, i32
  }
  func.func @transform_2(%arg0: i32, %arg1: i32) -> (i32, i32) {
    %c0_i32 = arith.constant 0 : i32
    %c0_i32_0 = arith.constant 0 : i32
    %c0_i32_1 = arith.constant 0 : i32
    return %c0_i32, %c0_i32_0 : i32, i32
  }
  func.func @transform_3(%arg0: i32, %arg1: i32) -> (i32, i32) {
    %c0_i32 = arith.constant 0 : i32
    %c0_i32_0 = arith.constant 0 : i32
    %c0_i32_1 = arith.constant 0 : i32
    return %c0_i32, %c0_i32_0 : i32, i32
  }
  func.func @transform_4(%arg0: i32, %arg1: i32) -> (i32, i32) {
    %0 = arith.muli %arg0, %arg1 : i32
    %c0_i32 = arith.constant 0 : i32
    %c0_i32_0 = arith.constant 0 : i32
    return %0, %c0_i32 : i32, i32
  }
}

</mosaic_0001>

<bundles_post_ra>
// kernel: unet_down_forward.1
= control target key start
LH: loop header
LB: loop body
LE: loop exit
PB: predicated region body
PF: predicated region fallthrough
CT: control target
= control target key end

     0   :  { %9 = vsyncpa [#allocation7], 0  ;;  %s1171_s0 = inlined_call_operand.vmem [shape: bf16[128,128], index: 0, kind: input, shape index: {}]   ;;  %s1172_s1 = inlined_call_operand.vmem [shape: bf16[128,128], index: 1, kind: input, shape index: {}]   ;;  %s1173_s2 = inlined_call_operand.vmem [shape: f32[1,128], index: 2, kind: input, shape index: {}]   ;;  %s1174_s3 = inlined_call_operand.vmem [shape: f32[1,128], index: 3, kind: input, shape index: {}]   ;;  %s1175_s4 = inlined_call_operand.hbm [shape: f32[128,128], index: 4, kind: output, shape index: {}]  }
   0x1   :  { %11 = vsyncpa [#allocation7 + $0x1], 0  ;;  %s940_s15 = smov 0   ;;  %s942_s16 = smov 0  }
   0x2   :  { %s944_s17 = smov 0  }
   0x3 LB: > { %s693_s18 = sadd.s32 4294967295, %s909_s17   ;;  %s694_s19 = sadd.s32 4294967294, %s909_s17   ;;  %s909_s17 = sphi %s944_s17, %s17_s17   ;;  %s905_s16 = sphi %s942_s16, %s1177_s16   ;;  %s901_s15 = sphi %s940_s15, %s1176_s15  }
   0x4   : > { %s29_s20 = sadd.s32 1, %s905_s16  ;;  %p697_p0 = scmp.ge.s32.totalorder %s909_s17, 1 }
   0x5   : > { %p31_p1 = scmp.ge.s32.totalorder %s29_s20, 2  ;;  %p180_p2 = scmp.lt.s32.totalorder %s909_s17, 3 }
   0x7   : > { %s1179_s20 = smov (%p31_p1, %s29_s20), 0  ;;  %p181_p3 = pnand %p697_p0, %p180_p2 }
   0x8   : > { %p391_p4 = scmp.eq.s32.totalorder (!%p181_p3), %s901_s15, 0 }
   0x9   : > { %184 = sbr.rel (%p181_p3) target bundleno = 335 (0x14f), region = 36 }
   0xe   : > { %v785_v0 = vld [vmem:[%s1172_s1 + $0x38] sm:$0xff]  ;;  %v784_v1 = vld [vmem:[%s1172_s1 + $0x30] sm:$0xff]  ;;  %v783_v2 = vld [vmem:[%s1172_s1 + $0x28] sm:$0xff]  ;;  %v911_v32 = vmov (%p391_p4), 0.0  }
   0xf   : > { %342 = vmatpush.bf16.msra.mxu0 %v785_v0  ;;  %788 = vmatpush.bf16.msra.mxu1 %v785_v0  ;;  %v782_v3 = vld [vmem:[%s1172_s1 + $0x20] sm:$0xff]  ;;  %v781_v4 = vld [vmem:[%s1172_s1 + $0x18] sm:$0xff]  ;;  %v780_v5 = vld [vmem:[%s1172_s1 + $0x10] sm:$0xff]  ;;  %397 = vst [vmem:[#allocation2] sm:$0xff] (%p391_p4), %v911_v32 }
  0x10   : > { %789 = vmatpush.bf16.msra.mxu2 %v785_v0  ;;  %790 = vmatpush.bf16.msra.mxu3 %v785_v0  ;;  %v779_v6 = vld [vmem:[%s1172_s1 + $0x8] sm:$0xff]  ;;  %v778_v7 = vld [vmem:[%s1172_s1] sm:$0xff]  ;;  %v772_v9 = vld [vmem:[%s1171_s0 + $0x10] sm:$0xff]  ;;  %398 = vst [vmem:[#allocation3] sm:$0xff] (%p391_p4), %v911_v32 }
  0x11   : > { %v770_v8 = vld [vmem:[%s1171_s0] sm:$0xff]  ;;  %v776_v11 = vld [vmem:[%s1171_s0 + $0x30] sm:$0xff]  ;;  %v771_v12 = vld [vmem:[%s1171_s0 + $0x8] sm:$0xff] }
  0x12   : > { %v774_v10 = vld [vmem:[%s1171_s0 + $0x20] sm:$0xff]  ;;  %v773_v13 = vld [vmem:[%s1171_s0 + $0x18] sm:$0xff]  ;;  %v775_v14 = vld [vmem:[%s1171_s0 + $0x28] sm:$0xff] }
  0x13   : > { %343 = vmatpush.bf16.msra.mxu0 %v784_v1  ;;  %791 = vmatpush.bf16.msra.mxu1 %v784_v1  ;;  %v777_v15 = vld [vmem:[%s1171_s0 + $0x38] sm:$0xff] }
  0x14   : > { %792 = vmatpush.bf16.msra.mxu2 %v784_v1  ;;  %793 = vmatpush.bf16.msra.mxu3 %v784_v1 }
  0x17   : > { %344 = vmatpush.bf16.msra.mxu0 %v783_v2  ;;  %794 = vmatpush.bf16.msra.mxu1 %v783_v2 }
  0x18   : > { %795 = vmatpush.bf16.msra.mxu2 %v783_v2  ;;  %796 = vmatpush.bf16.msra.mxu3 %v783_v2 }
  0x1b   : > { %345 = vmatpush.bf16.msra.mxu0 %v782_v3  ;;  %797 = vmatpush.bf16.msra.mxu1 %v782_v3 }
  0x1c   : > { %798 = vmatpush.bf16.msra.mxu2 %v782_v3  ;;  %799 = vmatpush.bf16.msra.mxu3 %v782_v3 }
  0x1f   : > { %346 = vmatpush.bf16.msra.mxu0 %v781_v4  ;;  %800 = vmatpush.bf16.msra.mxu1 %v781_v4 }
  0x20   : > { %801 = vmatpush.bf16.msra.mxu2 %v781_v4  ;;  %802 = vmatpush.bf16.msra.mxu3 %v781_v4 }
  0x23   : > { %347 = vmatpush.bf16.msra.mxu0 %v780_v5  ;;  %803 = vmatpush.bf16.msra.mxu1 %v780_v5 }
  0x24   : > { %804 = vmatpush.bf16.msra.mxu2 %v780_v5  ;;  %805 = vmatpush.bf16.msra.mxu3 %v780_v5 }
  0x27   : > { %348 = vmatpush.bf16.msra.mxu0 %v779_v6  ;;  %806 = vmatpush.bf16.msra.mxu1 %v779_v6 }
  0x28   : > { %807 = vmatpush.bf16.msra.mxu2 %v779_v6  ;;  %808 = vmatpush.bf16.msra.mxu3 %v779_v6 }
  0x2b   : > { %349 = vmatpush.bf16.msra.mxu0 %v778_v7  ;;  %809 = vmatpush.bf16.msra.mxu1 %v778_v7 }
  0x2c   : > { %810 = vmatpush.bf16.msra.mxu2 %v778_v7  ;;  %811 = vmatpush.bf16.msra.mxu3 %v778_v7 }
  0x2e   : > { %350 = vmatmul.bf16.vlgmr.msra.gmra.mxu0 %v770_v8  ;;  %360 = vmatmul.bf16.vlgmr.msra.gmra.mxu1 %v772_v9 }
  0x2f   : > { %370 = vmatmul.bf16.vlgmr.msra.gmra.mxu2 %v774_v10  ;;  %380 = vmatmul.bf16.vlgmr.msra.gmra.mxu3 %v776_v11 }
  0x3e   : > { %355 = vmatmul.bf16.gmra.mxu0 %v771_v12  ;;  %365 = vmatmul.bf16.gmra.mxu1 %v773_v13 }
  0x3f   : > { %375 = vmatmul.bf16.gmra.mxu2 %v775_v14  ;;  %385 = vmatmul.bf16.gmra.mxu3 %v777_v15 }
  0xab   : > { %v1011_v16 = vpop.f32.mrf.mxu0  ;;  %v1013_v17 = vpop.f32.mrf.mxu1 }
  0xb2   : > { %v1015_v18 = vpop.f32.mrf.mxu2  ;;  %v1017_v19 = vpop.f32.mrf.mxu3 }
  0xb3   : > { %v1019_v20 = vpop.f32.mrf.mxu0  ;;  %v1021_v21 = vpop.f32.mrf.mxu1 }
  0xba   : > { %v1023_v22 = vpop.f32.mrf.mxu2  ;;  %v1025_v23 = vpop.f32.mrf.mxu3 }
  0xbb   : > { %v1027_v24 = vpop.f32.mrf.mxu0  ;;  %v1029_v25 = vpop.f32.mrf.mxu1 }
  0xc2   : > { %v1031_v26 = vpop.f32.mrf.mxu2  ;;  %v1033_v27 = vpop.f32.mrf.mxu3 }
  0xc3   : > { %v1035_v28 = vpop.f32.mrf.mxu0  ;;  %v1037_v29 = vpop.f32.mrf.mxu1 }
  0xc6   : > { %396 = sbr.rel (!%p391_p4) target bundleno = 203 (0xcb), region = 40 }
  0xca   : > { %v1039_v30 = vpop.f32.mrf.mxu2  ;;  %v1041_v31 = vpop.f32.mrf.mxu3 }
  0xcb PF: > { %p763_p5 = scmp.ne.s32.totalorder %s901_s15, 0 }
  0xcd   : > { %401 = sbr.rel (%p763_p5) target bundleno = 245 (0xf5), region = 44 }
  0xd2   : > { %v403_v33 = vadd.f32 %v1019_v20, %v1011_v16  ;;  %v421_v34 = vmul.f32 %v1011_v16, %v1011_v16  ;;  %v422_v35 = vmul.f32 %v1019_v20, %v1019_v20  ;;  %v423_v37 = vmul.f32 %v1027_v24, %v1027_v24  ;;  %v402_v10 = vld [vmem:[#allocation2] sm:$0xff]  ;;  %v420_v32 = vld [vmem:[#allocation3] sm:$0xff] }
  0xd3   : > { %v424_v39 = vmul.f32 %v1035_v28, %v1035_v28  ;;  %v425_v42 = vmul.f32 %v1013_v17, %v1013_v17  ;;  %v426_v45 = vmul.f32 %v1021_v21, %v1021_v21  ;;  %v427_v48 = vmul.f32 %v1029_v25, %v1029_v25 }
  0xd4   : > { %v404_v36 = vadd.f32 %v403_v33, %v1027_v24  ;;  %v437_v40 = vadd.f32 %v422_v35, %v421_v34  ;;  %v428_v51 = vmul.f32 %v1037_v29, %v1037_v29  ;;  %v429_v54 = vmul.f32 %v1015_v18, %v1015_v18 }
  0xd5   : > { %v430_v57 = vmul.f32 %v1023_v22, %v1023_v22  ;;  %v431_v60 = vmul.f32 %v1031_v26, %v1031_v26  ;;  %v432_v63 = vmul.f32 %v1039_v30, %v1039_v30  ;;  %v433_v2 = vmul.f32 %v1017_v19, %v1017_v19 }
  0xd6   : > { %v405_v38 = vadd.f32 %v404_v36, %v1035_v28  ;;  %v438_v43 = vadd.f32 %v437_v40, %v423_v37  ;;  %v434_v5 = vmul.f32 %v1025_v23, %v1025_v23  ;;  %v435_v8 = vmul.f32 %v1033_v27, %v1033_v27 }
  0xd7   : > { %v436_v12 = vmul.f32 %v1041_v31, %v1041_v31 }
  0xd8   : > { %v406_v41 = vadd.f32 %v405_v38, %v1013_v17  ;;  %v439_v46 = vadd.f32 %v438_v43, %v424_v39 }
  0xda   : > { %v407_v44 = vadd.f32 %v406_v41, %v1021_v21  ;;  %v440_v49 = vadd.f32 %v439_v46, %v425_v42 }
  0xdc   : > { %v408_v47 = vadd.f32 %v407_v44, %v1029_v25  ;;  %v441_v52 = vadd.f32 %v440_v49, %v426_v45 }
  0xde   : > { %v409_v50 = vadd.f32 %v408_v47, %v1037_v29  ;;  %v442_v55 = vadd.f32 %v441_v52, %v427_v48 }
  0xe0   : > { %v410_v53 = vadd.f32 %v409_v50, %v1015_v18  ;;  %v443_v58 = vadd.f32 %v442_v55, %v428_v51 }
  0xe2   : > { %v411_v56 = vadd.f32 %v410_v53, %v1023_v22  ;;  %v444_v61 = vadd.f32 %v443_v58, %v429_v54 }
  0xe4   : > { %v412_v59 = vadd.f32 %v411_v56, %v1031_v26  ;;  %v445_v0 = vadd.f32 %v444_v61, %v430_v57 }
  0xe6   : > { %v413_v62 = vadd.f32 %v412_v59, %v1039_v30  ;;  %v446_v3 = vadd.f32 %v445_v0, %v431_v60 }
  0xe8   : > { %v414_v1 = vadd.f32 %v413_v62, %v1017_v19  ;;  %v447_v6 = vadd.f32 %v446_v3, %v432_v63 }
  0xea   : > { %v415_v4 = vadd.f32 %v414_v1, %v1025_v23  ;;  %v448_v9 = vadd.f32 %v447_v6, %v433_v2 }
  0xec   : > { %v416_v7 = vadd.f32 %v415_v4, %v1033_v27  ;;  %v449_v13 = vadd.f32 %v448_v9, %v434_v5 }
  0xee   : > { %v417_v11 = vadd.f32 %v416_v7, %v1041_v31  ;;  %v450_v15 = vadd.f32 %v449_v13, %v435_v8 }
  0xf0   : > { %v418_v14 = vadd.f32 %v417_v11, %v402_v10  ;;  %v451_v33 = vadd.f32 %v450_v15, %v436_v12 }
  0xf2   : > { %419 = vst [vmem:[#allocation2] sm:$0xff] %v418_v14  ;;  %v452_v34 = vadd.f32 %v451_v33, %v420_v32 }
  0xf4   : > { %453 = vst [vmem:[#allocation3] sm:$0xff] %v452_v34 }
  0xf5 PF: > { %p454_p6 = scmp.eq.s32.totalorder %s901_s15, 1 }
  0xf6   : > { %v478_v60 = vld [vmem:[%s1173_s2] sm:$0x1] (%p454_p6) }
  0xf7   : > { %458 = sbr.rel (!%p454_p6) target bundleno = 297 (0x129), region = 48  ;;  %v492_v0 = vld [vmem:[%s1174_s3] sm:$0x1] (%p454_p6) }
  0xf9   : > { %v459_v35 = vld [vmem:[#allocation2] sm:$0xff] (%p454_p6) }
  0xfa   : > { %v460_v37 = vrot.slane (%p454_p6), %v459_v35, 4 }
  0xfb   : > { %v467_v36 = vld [vmem:[#allocation3] sm:$0xff] (%p454_p6) }
  0xfc   : > { %v468_v38 = vrot.slane %v467_v36, 4  ;;  %v461_v39 = vadd.f32 %v460_v37, %v459_v35 }
  0xfe   : > { %v469_v40 = vadd.f32 %v468_v38, %v467_v36  ;;  %v462_v41 = vrot.slane %v461_v39, 2 }
 0x100   : > { %v470_v42 = vrot.slane %v469_v40, 2  ;;  %v463_v43 = vadd.f32 %v462_v41, %v461_v39 }
 0x102   : > { %v471_v44 = vadd.f32 %v470_v42, %v469_v40  ;;  %v464_v45 = vrot.slane %v463_v43, 1 }
 0x104   : > { %v472_v46 = vrot.slane %v471_v44, 1  ;;  %v465_v47 = vadd.f32 %v464_v45, %v463_v43 }
 0x106   : > { %v473_v48 = vadd.f32 %v472_v46, %v471_v44  ;;  %v466_v49 = vmul.f32 0.0078125, %v465_v47 }
 0x108   : > { %v474_v50 = vmul.f32 0.0078125, %v473_v48  ;;  %v475_v51 = vmul.f32 %v466_v49, %v466_v49 }
 0x10a   : > { %v476_v52 = vsub.f32 %v474_v50, %v475_v51 }
 0x10c   : > { %v477_v53 = vmax.f32 %v476_v52, 0.0 }
 0x10e   : > { %v479_v54 = vadd.f32 1e-05, %v477_v53 }
 0x110   : > { %851 = vrsqrt.f32 %v479_v54  ;;  %vm486_vm0 = vweird.f32 %v479_v54 }
 0x116   : > { %v852_v55 = vpop.eup %851 }
 0x117   : > { %v481_v56 = vmul.f32 %v852_v55, %v479_v54  ;;  %vm487_vm1 = vweird.f32 %v852_v55 }
 0x118   : > { %vm488_vm2 = vmor %vm486_vm0, %vm487_vm1 }
 0x119   : > { %v482_v57 = vmul.f32 %v852_v55, %v481_v56 }
 0x11b   : > { %v483_v58 = vmul.f32 0.5, %v482_v57 }
 0x11d   : > { %v484_v59 = vsub.f32 1.5, %v483_v58 }
 0x11f   : > { %v485_v61 = vmul.f32 %v852_v55, %v484_v59 }
 0x121   : > { %v489_v62 = vsel %vm488_vm2, %v852_v55, %v485_v61 }
 0x122   : > { %v490_v63 = vmul.f32 %v489_v62, %v478_v60 }
 0x124   : > { %491 = vst [vmem:[#allocation4] sm:$0x1] %v490_v63  ;;  %v493_v1 = vmul.f32 %v490_v63, %v466_v49 }
 0x126   : > { %v494_v2 = vsub.f32 %v492_v0, %v493_v1 }
 0x128   : > { %495 = vst [vmem:[#allocation5] sm:$0x1] %v494_v2 }
 0x129 PF: > { %p765_p7 = scmp.ne.s32.totalorder %s901_s15, 1 }
 0x12b   : > { %498 = sbr.rel (%p765_p7) target bundleno = 331 (0x14b), region = 52 }
 0x130   : > { %v1102_v3 = vld [vmem:[#allocation4] ss:$0 sm:$0xff]  ;;  %v1104_v4 = vld [vmem:[#allocation5] ss:$0 sm:$0xff] }
 0x131   : > { %v503_v5 = vmul.f32 %v1102_v3, %v1011_v16  ;;  %v504_v6 = vmul.f32 %v1102_v3, %v1019_v20  ;;  %v505_v7 = vmul.f32 %v1102_v3, %v1027_v24  ;;  %v506_v8 = vmul.f32 %v1102_v3, %v1035_v28 }
 0x132   : > { %v507_v9 = vmul.f32 %v1102_v3, %v1013_v17  ;;  %v508_v10 = vmul.f32 %v1102_v3, %v1021_v21  ;;  %v509_v11 = vmul.f32 %v1102_v3, %v1029_v25  ;;  %v510_v16 = vmul.f32 %v1102_v3, %v1037_v29 }
 0x133   : > { %v523_v20 = vadd.f32 %v1104_v4, %v503_v5  ;;  %v524_v12 = vadd.f32 %v1104_v4, %v504_v6  ;;  %v525_v24 = vadd.f32 %v1104_v4, %v505_v7  ;;  %v526_v28 = vadd.f32 %v1104_v4, %v506_v8 }
 0x134   : > { %v527_v13 = vadd.f32 %v1104_v4, %v507_v9  ;;  %v528_v17 = vadd.f32 %v1104_v4, %v508_v10  ;;  %v529_v21 = vadd.f32 %v1104_v4, %v509_v11  ;;  %v530_v14 = vadd.f32 %v1104_v4, %v510_v16 }
 0x135   : > { %vm539_vm3 = vcmp.ge.f32.partialorder %v523_v20, 0.0  ;;  %v555_v25 = vmul.f32 0.2, %v523_v20  ;;  %vm540_vm4 = vcmp.ge.f32.partialorder %v524_v12, 0.0  ;;  %v556_v29 = vmul.f32 0.2, %v524_v12 }
 0x136   : > { %vm541_vm5 = vcmp.ge.f32.partialorder %v525_v24, 0.0  ;;  %v557_v15 = vmul.f32 0.2, %v525_v24  ;;  %vm542_vm6 = vcmp.ge.f32.partialorder %v526_v28, 0.0  ;;  %v558_v32 = vmul.f32 0.2, %v526_v28 }
 0x137   : > { %v571_v33 = vsel %vm539_vm3, %v523_v20, %v555_v25  ;;  %v572_v34 = vsel %vm540_vm4, %v524_v12, %v556_v29  ;;  %vm543_vm7 = vcmp.ge.f32.partialorder %v527_v13, 0.0  ;;  %v559_v35 = vmul.f32 0.2, %v527_v13 }
 0x138   : > { %587 = vst [vmem:[#allocation6] sm:$0xff] %v571_v33  ;;  %v573_v36 = vsel %vm541_vm5, %v525_v24, %v557_v15  ;;  %v574_v37 = vsel %vm542_vm6, %v526_v28, %v558_v32  ;;  %vm544_vm8 = vcmp.ge.f32.partialorder %v528_v17, 0.0  ;;  %v560_v38 = vmul.f32 0.2, %v528_v17 }
 0x139   : > { %588 = vst [vmem:[#allocation6 + $0x8] sm:$0xff] %v572_v34  ;;  %v575_v39 = vsel %vm543_vm7, %v527_v13, %v559_v35  ;;  %vm545_vm9 = vcmp.ge.f32.partialorder %v529_v21, 0.0  ;;  %v561_v40 = vmul.f32 0.2, %v529_v21  ;;  %vm546_vm10 = vcmp.ge.f32.partialorder %v530_v14, 0.0 }
 0x13a   : > { %589 = vst [vmem:[#allocation6 + $0x10] sm:$0xff] %v573_v36  ;;  %v576_v41 = vsel %vm544_vm8, %v528_v17, %v560_v38  ;;  %v562_v42 = vmul.f32 0.2, %v530_v14  ;;  %v511_v43 = vmul.f32 %v1102_v3, %v1015_v18  ;;  %v512_v44 = vmul.f32 %v1102_v3, %v1023_v22 }
 0x13b   : > { %590 = vst [vmem:[#allocation6 + $0x18] sm:$0xff] %v574_v37  ;;  %v577_v45 = vsel %vm545_vm9, %v529_v21, %v561_v40  ;;  %v513_v46 = vmul.f32 %v1102_v3, %v1031_v26  ;;  %v514_v47 = vmul.f32 %v1102_v3, %v1039_v30  ;;  %v515_v48 = vmul.f32 %v1102_v3, %v1017_v19 }
 0x13c   : > { %591 = vst [vmem:[#allocation6 + $0x20] sm:$0xff] %v575_v39  ;;  %v578_v49 = vsel %vm546_vm10, %v530_v14, %v562_v42  ;;  %v531_v50 = vadd.f32 %v1104_v4, %v511_v43  ;;  %v532_v18 = vadd.f32 %v1104_v4, %v512_v44  ;;  %v516_v22 = vmul.f32 %v1102_v3, %v1025_v23 }
 0x13d   : > { %592 = vst [vmem:[#allocation6 + $0x28] sm:$0xff] %v576_v41  ;;  %v533_v51 = vadd.f32 %v1104_v4, %v513_v46  ;;  %v534_v26 = vadd.f32 %v1104_v4, %v514_v47  ;;  %v535_v52 = vadd.f32 %v1104_v4, %v515_v48  ;;  %v517_v30 = vmul.f32 %v1102_v3, %v1033_v27 }
 0x13e   : > { %593 = vst [vmem:[#allocation6 + $0x30] sm:$0xff] %v577_v45  ;;  %vm547_vm11 = vcmp.ge.f32.partialorder %v531_v50, 0.0  ;;  %v563_v19 = vmul.f32 0.2, %v531_v50  ;;  %vm548_vm12 = vcmp.ge.f32.partialorder %v532_v18, 0.0  ;;  %v536_v53 = vadd.f32 %v1104_v4, %v516_v22 }
 0x13f   : > { %594 = vst [vmem:[#allocation6 + $0x38] sm:$0xff] %v578_v49  ;;  %v564_v54 = vmul.f32 0.2, %v532_v18  ;;  %vm549_vm13 = vcmp.ge.f32.partialorder %v533_v51, 0.0  ;;  %v565_v23 = vmul.f32 0.2, %v533_v51  ;;  %v537_v55 = vadd.f32 %v1104_v4, %v517_v30 }
 0x140   : > { %v579_v56 = vsel %vm547_vm11, %v531_v50, %v563_v19  ;;  %vm550_vm14 = vcmp.ge.f32.partialorder %v534_v26, 0.0  ;;  %v566_v57 = vmul.f32 0.2, %v534_v26  ;;  %vm551_vm15 = vcmp.ge.f32.partialorder %v535_v52, 0.0 }
 0x141   : > { %595 = vst [vmem:[#allocation6 + $0x40] sm:$0xff] %v579_v56  ;;  %v580_v58 = vsel %vm548_vm12, %v532_v18, %v564_v54  ;;  %v581_v59 = vsel %vm549_vm13, %v533_v51, %v565_v23  ;;  %v567_v27 = vmul.f32 0.2, %v535_v52  ;;  %vm552_vm0 = vcmp.ge.f32.partialorder %v536_v53, 0.0 }
 0x142   : > { %596 = vst [vmem:[#allocation6 + $0x48] sm:$0xff] %v580_v58  ;;  %v582_v60 = vsel %vm550_vm14, %v534_v26, %v566_v57  ;;  %v568_v61 = vmul.f32 0.2, %v536_v53  ;;  %vm553_vm1 = vcmp.ge.f32.partialorder %v537_v55, 0.0  ;;  %v569_v62 = vmul.f32 0.2, %v537_v55 }
 0x143   : > { %597 = vst [vmem:[#allocation6 + $0x50] sm:$0xff] %v581_v59  ;;  %v583_v63 = vsel %vm551_vm15, %v535_v52, %v567_v27  ;;  %v518_v0 = vmul.f32 %v1102_v3, %v1041_v31 }
 0x144   : > { %598 = vst [vmem:[#allocation6 + $0x58] sm:$0xff] %v582_v60  ;;  %v584_v1 = vsel %vm552_vm0, %v536_v53, %v568_v61  ;;  %v585_v2 = vsel %vm553_vm1, %v537_v55, %v569_v62 }
 0x145   : > { %599 = vst [vmem:[#allocation6 + $0x60] sm:$0xff] %v583_v63  ;;  %v538_v5 = vadd.f32 %v1104_v4, %v518_v0 }
 0x146   : > { %600 = vst [vmem:[#allocation6 + $0x68] sm:$0xff] %v584_v1 }
 0x147   : > { %601 = vst [vmem:[#allocation6 + $0x70] sm:$0xff] %v585_v2  ;;  %vm554_vm2 = vcmp.ge.f32.partialorder %v538_v5, 0.0  ;;  %v570_v6 = vmul.f32 0.2, %v538_v5 }
 0x149   : > { %v586_v7 = vsel %vm554_vm2, %v538_v5, %v570_v6 }
 0x14a   : > { %602 = vst [vmem:[#allocation6 + $0x78] sm:$0xff] %v586_v7 }
 0x14b PF: > { %p820_p8 = scmp.eq.s32.totalorder %s693_s18, 1  ;;  %s619_s12 = sshll.u32 %s1175_s4, 4  ;;  %s620_s12 = int_to_ptr.hbm [resolvable:$true] %s619_s12 }
 0x14c   : > { %s912_s13 = smov [#allocation6]   ;;  %s913_s21 = smov 128  }
 0x14d   : > { %s617_s14 = sshll.u32 %s912_s13, 4  ;;  %s914_s22 = smov 8   ;;  %s618_s14 = int_to_ptr.vmem [resolvable:$true] %s617_s14 }
 0x14e   : > { %813 = dma.vmem_to_hbm [thread:$0]  (%p820_p8), %s618_s14, 2048, %s620_s12, [#allocation7], %s913_s21, %s913_s21, %s914_s22  }
 0x14f PF: > { %p821_p9 = scmp.ge.s32.totalorder %s909_s17, 2  ;;  %p822_p10 = scmp.eq.s32.totalorder %s694_s19, 1 }
 0x151   : > { %p817_p11 = pnand %p822_p10, %p821_p9 }
 0x153   : > { %p818_p12 = pneg %p817_p11 }
 0x155   : > { %896 = dma.done.wait (%p818_p12), [#allocation7], 2048  }
 0x156   : > { %898 = vsyncadd (%p818_p12), [#allocation7], 4294965248  ;;  %s17_s17 = sadd.s32 1, %s909_s17   ;;  %s1176_s15 = smov %s905_s16 }
 0x157   : > { %p14_p13 = scmp.ge.s32.totalorder %s17_s17, 4   ;;  %s1177_s16 = smov %s1179_s20 }
 0x159   :  { %16 = sbr.rel (!%p14_p13) target bundleno = 3 (0x3), region = 87 }
 0x15e   :  { %641 = vsyncpa [#allocation7], 1 }
 0x15f   :  { %643 = vsyncpa [#allocation7 + $0x1], 1 }

</bundles_post_ra>
